<compile_context>
chip_gen: v6e
topology: v6e:2x2x1
jax: 0.10.0
libtpu: 0.0.40
codegen_flags: <defaults>
</compile_context>

<pallas_src>
import jax
import jax.numpy as jnp
from jax.experimental import pallas as pl
from jax.experimental.pallas import tpu as pltpu


# ----------------------------------------------------------------------------
# Fused kernel
# ----------------------------------------------------------------------------
def _make_fcn_kernel(N, C, H, W):
    R = N * C                     # row axis (sublanes): r = n*C + c
    Hp, Wp = H + 2, W + 2         # padded conv1 input == final output spatial
    S_out = Hp * Wp               # flattened output length (lane axis)
    OFF = 2 * Wp + 2              # flat offset aligning conv taps with output q
    L = S_out + 4 * Wp + 4        # flat scratch length (covers max tap shift)

    def kernel(x_ref, a1_ref, b_ref, a23_ref, bgm_ref, o_ref, xs_ref, u_ref):
        # --- build the zero-padded, flattened input in VMEM scratch ----------
        xs_ref[...] = jnp.zeros_like(xs_ref)
        xv = x_ref[...]                                   # (R, H*W)
        for a in range(1, H + 1):                         # interior rows only
            dst = OFF + a * Wp + 1
            src = (a - 1) * W
            xs_ref[:, dst:dst + W] = xv[:, src:src + W]

        # --- im2col: stack the 25 shifted views along the row axis -----------
        xsv = xs_ref[...]                                 # (R, L)
        for t in range(25):
            off = (t // 5) * Wp + (t % 5)
            u_ref[t * R:(t + 1) * R, :] = xsv[:, off:off + S_out]

        # --- conv1 (5x5) as ONE MXU matmul over K = 25*R ----------------------
        h = jnp.dot(a1_ref[...], u_ref[...], preferred_element_type=jnp.float32)
        h = jnp.maximum(h + b_ref[0], 0.0)
        # --- conv2 / conv3 (1x1) as block-diagonal channel mixes --------------
        h = jnp.dot(a23_ref[0], h, preferred_element_type=jnp.float32)
        h = jnp.maximum(h + b_ref[1], 0.0)
        h = jnp.dot(a23_ref[1], h, preferred_element_type=jnp.float32)
        h = jnp.maximum(h + b_ref[2], 0.0)
        # --- inner region from h, constant rings from precomputed background --
        o_ref[...] = (bgm_ref[0] * h + bgm_ref[1]).astype(o_ref.dtype)

    return kernel


# ----------------------------------------------------------------------------
# Forward wrapper (single pallas_call, no pads / transposes around it)
# ----------------------------------------------------------------------------
def fcn_forward(x_nchw, prep):
    """FCN.forward.  Input/output in PyTorch NCHW layout."""
    N, C, H, W = x_nchw.shape
    R = N * C
    Hp, Wp = H + 2, W + 2
    S_in, S_out = H * W, Hp * Wp
    L = S_out + 4 * Wp + 4
    x_flat = x_nchw.reshape(R, S_in)          # contiguous reshape -> free

    def full(shape):
        return pl.BlockSpec(shape, lambda i: (0,) * len(shape))

    out_flat = pl.pallas_call(
        _make_fcn_kernel(N, C, H, W),
        out_shape=jax.ShapeDtypeStruct((R, S_out), x_nchw.dtype),
        grid=(1,),
        in_specs=[full((R, S_in)),            # x              (8, 256)
                  full((R, 25 * R)),          # im2col weights (8, 200)
                  full((3, R, 1)),            # biases         (3, 8, 1)
                  full((2, R, R)),            # 1x1 mixes      (2, 8, 8)
                  full((2, R, S_out))],       # mask + rings   (2, 8, 324)
        out_specs=full((R, S_out)),
        scratch_shapes=[pltpu.VMEM((R, L), jnp.float32),         # flat padded x
                        pltpu.VMEM((25 * R, S_out), jnp.float32)],  # im2col U
        compiler_params=pltpu.CompilerParams(
            dimension_semantics=("arbitrary",)),
    )(x_flat, prep["A1"], prep["B"], prep["A23"], prep["BGM"])
    return out_flat.reshape(N, C, Hp, Wp)     # contiguous reshape -> free


# ----------------------------------------------------------------------------
# One-time parameter preparation (hoisted out of the hot path)
# ----------------------------------------------------------------------------
def prepare_params(params, N, H, W):
    f32 = jnp.float32
    C = params["b1"].shape[0]
    R = N * C
    Hp, Wp = H + 2, W + 2
    S_out = Hp * Wp

    W1 = params["w1_oihw"].astype(f32)                 # (co, ci, 5, 5)
    W2 = params["w2_oihw"][:, :, 0, 0].astype(f32)     # (co, ci)
    W3 = params["w3_oihw"][:, :, 0, 0].astype(f32)
    b1 = params["b1"].astype(f32)
    b2 = params["b2"].astype(f32)
    b3 = params["b3"].astype(f32)

    eye = jnp.eye(N, dtype=f32)
    # conv1 im2col matrix: A1[n*C+co, t*R + m*C + ci] = W1[co,ci,kh,kw] * (m==n)
    w1_t = jnp.transpose(W1.reshape(C, C, 25), (0, 2, 1))       # (co, t, ci)
    A1 = (eye[:, None, None, :, None] *
          w1_t[None, :, :, None, :]).reshape(R, 25 * R)
    # 1x1 convs as block-diagonal (batch-preserving) channel mixes
    A2 = (eye[:, None, :, None] * W2[None, :, None, :]).reshape(R, R)
    A3 = (eye[:, None, :, None] * W3[None, :, None, :]).reshape(R, R)

    b1c = jnp.tile(b1, N).reshape(R, 1)
    b2c = jnp.tile(b2, N).reshape(R, 1)
    b3c = jnp.tile(b3, N).reshape(R, 1)

    # ring constants produced by the k=1, p=1 convs acting on zero padding
    r3 = jnp.maximum(b3, 0.0)                                   # outer ring
    r2 = jnp.maximum(b3 + W3 @ jnp.maximum(b2, 0.0), 0.0)       # second ring

    ih, iw = jnp.arange(Hp), jnp.arange(Wp)
    in_c = lambda i, n: (i >= 2) & (i <= n - 3)
    in_b = lambda i, n: (i >= 1) & (i <= n - 2)
    mC = in_c(ih, Hp)[:, None] & in_c(iw, Wp)[None, :]          # computed inner
    mBfull = in_b(ih, Hp)[:, None] & in_b(iw, Wp)[None, :]
    mB = mBfull & ~mC                                           # second ring
    mA = ~mBfull                                                # outer ring

    maskC = jnp.tile(mC.reshape(1, S_out).astype(f32), (R, 1))
    bg = (jnp.tile(r2, N)[:, None] * mB.reshape(1, S_out).astype(f32) +
          jnp.tile(r3, N)[:, None] * mA.reshape(1, S_out).astype(f32))

    # pack constants into few, larger arrays -> fewer input DMAs per call
    return {"A1": A1,
            "B": jnp.stack([b1c, b2c, b3c], axis=0),            # (3, R, 1)
            "A23": jnp.stack([A2, A3], axis=0),                 # (2, R, R)
            "BGM": jnp.stack([maskC, bg], axis=0)}              # (2, R, S_out)


# ----------------------------------------------------------------------------
# Deterministic parameter init + pure-JAX reference
# ----------------------------------------------------------------------------
def init_params(key, channels):
    ks = jax.random.split(key, 6)
    s5 = 1.0 / (channels * 25) ** 0.5
    s1 = 1.0 / channels ** 0.5
    return {
        "w1_oihw": jax.random.uniform(ks[0], (channels, channels, 5, 5),
                                      jnp.float32, -s5, s5),
        "b1": jax.random.uniform(ks[1], (channels,), jnp.float32, -s5, s5),
        "w2_oihw": jax.random.uniform(ks[2], (channels, channels, 1, 1),
                                      jnp.float32, -s1, s1),
        "b2": jax.random.uniform(ks[3], (channels,), jnp.float32, -s1, s1),
        "w3_oihw": jax.random.uniform(ks[4], (channels, channels, 1, 1),
                                      jnp.float32, -s1, s1),
        "b3": jax.random.uniform(ks[5], (channels,), jnp.float32, -s1, s1),
    }


def fcn_reference(x_nchw, params):
    def conv_relu(x, w_oihw, b, pad):
        y = jax.lax.conv_general_dilated(
            x, w_oihw, window_strides=(1, 1),
            padding=((pad, pad), (pad, pad)),
            dimension_numbers=("NCHW", "OIHW", "NCHW"))
        return jnp.maximum(y + b.reshape(1, -1, 1, 1), 0.0)
    x = conv_relu(x_nchw, params["w1_oihw"], params["b1"], 1)
    x = conv_relu(x, params["w2_oihw"], params["b2"], 1)
    x = conv_relu(x, params["w3_oihw"], params["b3"], 1)
    return x


if __name__ == "__main__":
    key = jax.random.PRNGKey(0)
    k_x, k_p = jax.random.split(key)

    N, C, H, W = 2, 4, 16, 16          # small shapes consistent with FCN(channels=4)
    x = jax.random.normal(k_x, (N, C, H, W), jnp.float32)
    params = init_params(k_p, C)
    prep = prepare_params(params, N, H, W)      # one-time weight preparation

    fwd = jax.jit(fcn_forward)
    out = jax.block_until_ready(fwd(x, prep))
    ref = jax.block_until_ready(fcn_reference(x, params))

    assert out.shape == (N, C, H + 2, W + 2), out.shape
    assert jnp.allclose(out, ref, atol=1e-3, rtol=1e-3), \
        float(jnp.max(jnp.abs(out - ref)))
    print("KERNEL_OK")
</pallas_src>

<mosaic_0001>
module attributes {stable_mosaic.version = 11 : i64} {
  func.func @kernel(%arg0: i32, %arg1: memref<8x256xf32, #tpu.memory_space<vmem>>, %arg2: memref<8x200xf32, #tpu.memory_space<vmem>>, %arg3: memref<3x8x1xf32, #tpu.memory_space<vmem>>, %arg4: memref<2x8x8xf32, #tpu.memory_space<vmem>>, %arg5: memref<2x8x324xf32, #tpu.memory_space<vmem>>, %arg6: memref<8x324xf32, #tpu.memory_space<vmem>>, %arg7: memref<8x400xf32, #tpu.memory_space<vmem>>, %arg8: memref<200x324xf32, #tpu.memory_space<vmem>>) attributes {dimension_semantics = [#tpu.dimension_semantics<arbitrary>], iteration_bounds = array<i64: 1>, scalar_prefetch = 0 : i64, scratch_operands = 2 : i64, tpu.core_type = #tpu.core_type<tc>, window_params = [{pipeline_mode = #tpu.pipeline_mode<synchronous>, transform_indices = @transform_0, window_bounds = array<i64: 8, 256>}, {pipeline_mode = #tpu.pipeline_mode<synchronous>, transform_indices = @transform_1, window_bounds = array<i64: 8, 200>}, {pipeline_mode = #tpu.pipeline_mode<synchronous>, transform_indices = @transform_2, window_bounds = array<i64: 3, 8, 1>}, {pipeline_mode = #tpu.pipeline_mode<synchronous>, transform_indices = @transform_3, window_bounds = array<i64: 2, 8, 8>}, {pipeline_mode = #tpu.pipeline_mode<synchronous>, transform_indices = @transform_4, window_bounds = array<i64: 2, 8, 324>}, {pipeline_mode = #tpu.pipeline_mode<synchronous>, transform_indices = @transform_5, window_bounds = array<i64: 8, 324>}]} {
    %cst = arith.constant 0.000000e+00 : f32
    %0 = vector.broadcast %cst : f32 to vector<8x400xf32>
    %c0 = arith.constant 0 : index
    %c0_0 = arith.constant 0 : index
    %1 = vector.load %arg7[%c0, %c0_0] : memref<8x400xf32, #tpu.memory_space<vmem>>, vector<8x400xf32>
    tpu.vector_store %arg7[%c0, %c0_0], %0 {strides = array<i32>} : memref<8x400xf32, #tpu.memory_space<vmem>>, vector<8x400xf32>,
    %c0_1 = arith.constant 0 : index
    %c0_2 = arith.constant 0 : index
    %2 = vector.load %arg1[%c0_1, %c0_2] : memref<8x256xf32, #tpu.memory_space<vmem>>, vector<8x256xf32>
    %3 = vector.extract_strided_slice %2 {offsets = [0, 0], sizes = [8, 16], strides = [1, 1]} : vector<8x256xf32> to vector<8x16xf32>
    %c0_3 = arith.constant 0 : index
    %c57 = arith.constant 57 : index
    %4 = vector.load %arg7[%c0_3, %c57] : memref<8x400xf32, #tpu.memory_space<vmem>>, vector<8x16xf32>
    tpu.vector_store %arg7[%c0_3, %c57], %3 {strides = array<i32>} : memref<8x400xf32, #tpu.memory_space<vmem>>, vector<8x16xf32>,
    %5 = vector.extract_strided_slice %2 {offsets = [0, 16], sizes = [8, 16], strides = [1, 1]} : vector<8x256xf32> to vector<8x16xf32>
    %c0_4 = arith.constant 0 : index
    %c75 = arith.constant 75 : index
    %6 = vector.load %arg7[%c0_4, %c75] : memref<8x400xf32, #tpu.memory_space<vmem>>, vector<8x16xf32>
    tpu.vector_store %arg7[%c0_4, %c75], %5 {strides = array<i32>} : memref<8x400xf32, #tpu.memory_space<vmem>>, vector<8x16xf32>,
    %7 = vector.extract_strided_slice %2 {offsets = [0, 32], sizes = [8, 16], strides = [1, 1]} : vector<8x256xf32> to vector<8x16xf32>
    %c0_5 = arith.constant 0 : index
    %c93 = arith.constant 93 : index
    %8 = vector.load %arg7[%c0_5, %c93] : memref<8x400xf32, #tpu.memory_space<vmem>>, vector<8x16xf32>
    tpu.vector_store %arg7[%c0_5, %c93], %7 {strides = array<i32>} : memref<8x400xf32, #tpu.memory_space<vmem>>, vector<8x16xf32>,
    %9 = vector.extract_strided_slice %2 {offsets = [0, 48], sizes = [8, 16], strides = [1, 1]} : vector<8x256xf32> to vector<8x16xf32>
    %c0_6 = arith.constant 0 : index
    %c111 = arith.constant 111 : index
    %10 = vector.load %arg7[%c0_6, %c111] : memref<8x400xf32, #tpu.memory_space<vmem>>, vector<8x16xf32>
    tpu.vector_store %arg7[%c0_6, %c111], %9 {strides = array<i32>} : memref<8x400xf32, #tpu.memory_space<vmem>>, vector<8x16xf32>,
    %11 = vector.extract_strided_slice %2 {offsets = [0, 64], sizes = [8, 16], strides = [1, 1]} : vector<8x256xf32> to vector<8x16xf32>
    %c0_7 = arith.constant 0 : index
    %c129 = arith.constant 129 : index
    %12 = vector.load %arg7[%c0_7, %c129] : memref<8x400xf32, #tpu.memory_space<vmem>>, vector<8x16xf32>
    tpu.vector_store %arg7[%c0_7, %c129], %11 {strides = array<i32>} : memref<8x400xf32, #tpu.memory_space<vmem>>, vector<8x16xf32>,
    %13 = vector.extract_strided_slice %2 {offsets = [0, 80], sizes = [8, 16], strides = [1, 1]} : vector<8x256xf32> to vector<8x16xf32>
    %c0_8 = arith.constant 0 : index
    %c147 = arith.constant 147 : index
    %14 = vector.load %arg7[%c0_8, %c147] : memref<8x400xf32, #tpu.memory_space<vmem>>, vector<8x16xf32>
    tpu.vector_store %arg7[%c0_8, %c147], %13 {strides = array<i32>} : memref<8x400xf32, #tpu.memory_space<vmem>>, vector<8x16xf32>,
    %15 = vector.extract_strided_slice %2 {offsets = [0, 96], sizes = [8, 16], strides = [1, 1]} : vector<8x256xf32> to vector<8x16xf32>
    %c0_9 = arith.constant 0 : index
    %c165 = arith.constant 165 : index
    %16 = vector.load %arg7[%c0_9, %c165] : memref<8x400xf32, #tpu.memory_space<vmem>>, vector<8x16xf32>
    tpu.vector_store %arg7[%c0_9, %c165], %15 {strides = array<i32>} : memref<8x400xf32, #tpu.memory_space<vmem>>, vector<8x16xf32>,
    %17 = vector.extract_strided_slice %2 {offsets = [0, 112], sizes = [8, 16], strides = [1, 1]} : vector<8x256xf32> to vector<8x16xf32>
    %c0_10 = arith.constant 0 : index
    %c183 = arith.constant 183 : index
    %18 = vector.load %arg7[%c0_10, %c183] : memref<8x400xf32, #tpu.memory_space<vmem>>, vector<8x16xf32>
    tpu.vector_store %arg7[%c0_10, %c183], %17 {strides = array<i32>} : memref<8x400xf32, #tpu.memory_space<vmem>>, vector<8x16xf32>,
    %19 = vector.extract_strided_slice %2 {offsets = [0, 128], sizes = [8, 16], strides = [1, 1]} : vector<8x256xf32> to vector<8x16xf32>
    %c0_11 = arith.constant 0 : index
    %c201 = arith.constant 201 : index
    %20 = vector.load %arg7[%c0_11, %c201] : memref<8x400xf32, #tpu.memory_space<vmem>>, vector<8x16xf32>
    tpu.vector_store %arg7[%c0_11, %c201], %19 {strides = array<i32>} : memref<8x400xf32, #tpu.memory_space<vmem>>, vector<8x16xf32>,
    %21 = vector.extract_strided_slice %2 {offsets = [0, 144], sizes = [8, 16], strides = [1, 1]} : vector<8x256xf32> to vector<8x16xf32>
    %c0_12 = arith.constant 0 : index
    %c219 = arith.constant 219 : index
    %22 = vector.load %arg7[%c0_12, %c219] : memref<8x400xf32, #tpu.memory_space<vmem>>, vector<8x16xf32>
    tpu.vector_store %arg7[%c0_12, %c219], %21 {strides = array<i32>} : memref<8x400xf32, #tpu.memory_space<vmem>>, vector<8x16xf32>,
    %23 = vector.extract_strided_slice %2 {offsets = [0, 160], sizes = [8, 16], strides = [1, 1]} : vector<8x256xf32> to vector<8x16xf32>
    %c0_13 = arith.constant 0 : index
    %c237 = arith.constant 237 : index
    %24 = vector.load %arg7[%c0_13, %c237] : memref<8x400xf32, #tpu.memory_space<vmem>>, vector<8x16xf32>
    tpu.vector_store %arg7[%c0_13, %c237], %23 {strides = array<i32>} : memref<8x400xf32, #tpu.memory_space<vmem>>, vector<8x16xf32>,
    %25 = vector.extract_strided_slice %2 {offsets = [0, 176], sizes = [8, 16], strides = [1, 1]} : vector<8x256xf32> to vector<8x16xf32>
    %c0_14 = arith.constant 0 : index
    %c255 = arith.constant 255 : index
    %26 = vector.load %arg7[%c0_14, %c255] : memref<8x400xf32, #tpu.memory_space<vmem>>, vector<8x16xf32>
    tpu.vector_store %arg7[%c0_14, %c255], %25 {strides = array<i32>} : memref<8x400xf32, #tpu.memory_space<vmem>>, vector<8x16xf32>,
    %27 = vector.extract_strided_slice %2 {offsets = [0, 192], sizes = [8, 16], strides = [1, 1]} : vector<8x256xf32> to vector<8x16xf32>
    %c0_15 = arith.constant 0 : index
    %c273 = arith.constant 273 : index
    %28 = vector.load %arg7[%c0_15, %c273] : memref<8x400xf32, #tpu.memory_space<vmem>>, vector<8x16xf32>
    tpu.vector_store %arg7[%c0_15, %c273], %27 {strides = array<i32>} : memref<8x400xf32, #tpu.memory_space<vmem>>, vector<8x16xf32>,
    %29 = vector.extract_strided_slice %2 {offsets = [0, 208], sizes = [8, 16], strides = [1, 1]} : vector<8x256xf32> to vector<8x16xf32>
    %c0_16 = arith.constant 0 : index
    %c291 = arith.constant 291 : index
    %30 = vector.load %arg7[%c0_16, %c291] : memref<8x400xf32, #tpu.memory_space<vmem>>, vector<8x16xf32>
    tpu.vector_store %arg7[%c0_16, %c291], %29 {strides = array<i32>} : memref<8x400xf32, #tpu.memory_space<vmem>>, vector<8x16xf32>,
    %31 = vector.extract_strided_slice %2 {offsets = [0, 224], sizes = [8, 16], strides = [1, 1]} : vector<8x256xf32> to vector<8x16xf32>
    %c0_17 = arith.constant 0 : index
    %c309 = arith.constant 309 : index
    %32 = vector.load %arg7[%c0_17, %c309] : memref<8x400xf32, #tpu.memory_space<vmem>>, vector<8x16xf32>
    tpu.vector_store %arg7[%c0_17, %c309], %31 {strides = array<i32>} : memref<8x400xf32, #tpu.memory_space<vmem>>, vector<8x16xf32>,
    %33 = vector.extract_strided_slice %2 {offsets = [0, 240], sizes = [8, 16], strides = [1, 1]} : vector<8x256xf32> to vector<8x16xf32>
    %c0_18 = arith.constant 0 : index
    %c327 = arith.constant 327 : index
    %34 = vector.load %arg7[%c0_18, %c327] : memref<8x400xf32, #tpu.memory_space<vmem>>, vector<8x16xf32>
    tpu.vector_store %arg7[%c0_18, %c327], %33 {strides = array<i32>} : memref<8x400xf32, #tpu.memory_space<vmem>>, vector<8x16xf32>,
    %c0_19 = arith.constant 0 : index
    %c0_20 = arith.constant 0 : index
    %35 = vector.load %arg7[%c0_19, %c0_20] : memref<8x400xf32, #tpu.memory_space<vmem>>, vector<8x400xf32>
    %36 = vector.extract_strided_slice %35 {offsets = [0, 0], sizes = [8, 324], strides = [1, 1]} : vector<8x400xf32> to vector<8x324xf32>
    %c0_21 = arith.constant 0 : index
    %c0_22 = arith.constant 0 : index
    %37 = vector.load %arg8[%c0_21, %c0_22] : memref<200x324xf32, #tpu.memory_space<vmem>>, vector<8x324xf32>
    tpu.vector_store %arg8[%c0_21, %c0_22], %36 {strides = array<i32>} : memref<200x324xf32, #tpu.memory_space<vmem>>, vector<8x324xf32>,
    %38 = vector.extract_strided_slice %35 {offsets = [0, 1], sizes = [8, 324], strides = [1, 1]} : vector<8x400xf32> to vector<8x324xf32>
    %c8 = arith.constant 8 : index
    %c0_23 = arith.constant 0 : index
    %39 = vector.load %arg8[%c8, %c0_23] : memref<200x324xf32, #tpu.memory_space<vmem>>, vector<8x324xf32>
    tpu.vector_store %arg8[%c8, %c0_23], %38 {strides = array<i32>} : memref<200x324xf32, #tpu.memory_space<vmem>>, vector<8x324xf32>,
    %40 = vector.extract_strided_slice %35 {offsets = [0, 2], sizes = [8, 324], strides = [1, 1]} : vector<8x400xf32> to vector<8x324xf32>
    %c16 = arith.constant 16 : index
    %c0_24 = arith.constant 0 : index
    %41 = vector.load %arg8[%c16, %c0_24] : memref<200x324xf32, #tpu.memory_space<vmem>>, vector<8x324xf32>
    tpu.vector_store %arg8[%c16, %c0_24], %40 {strides = array<i32>} : memref<200x324xf32, #tpu.memory_space<vmem>>, vector<8x324xf32>,
    %42 = vector.extract_strided_slice %35 {offsets = [0, 3], sizes = [8, 324], strides = [1, 1]} : vector<8x400xf32> to vector<8x324xf32>
    %c24 = arith.constant 24 : index
    %c0_25 = arith.constant 0 : index
    %43 = vector.load %arg8[%c24, %c0_25] : memref<200x324xf32, #tpu.memory_space<vmem>>, vector<8x324xf32>
    tpu.vector_store %arg8[%c24, %c0_25], %42 {strides = array<i32>} : memref<200x324xf32, #tpu.memory_space<vmem>>, vector<8x324xf32>,
    %44 = vector.extract_strided_slice %35 {offsets = [0, 4], sizes = [8, 324], strides = [1, 1]} : vector<8x400xf32> to vector<8x324xf32>
    %c32 = arith.constant 32 : index
    %c0_26 = arith.constant 0 : index
    %45 = vector.load %arg8[%c32, %c0_26] : memref<200x324xf32, #tpu.memory_space<vmem>>, vector<8x324xf32>
    tpu.vector_store %arg8[%c32, %c0_26], %44 {strides = array<i32>} : memref<200x324xf32, #tpu.memory_space<vmem>>, vector<8x324xf32>,
    %46 = vector.extract_strided_slice %35 {offsets = [0, 18], sizes = [8, 324], strides = [1, 1]} : vector<8x400xf32> to vector<8x324xf32>
    %c40 = arith.constant 40 : index
    %c0_27 = arith.constant 0 : index
    %47 = vector.load %arg8[%c40, %c0_27] : memref<200x324xf32, #tpu.memory_space<vmem>>, vector<8x324xf32>
    tpu.vector_store %arg8[%c40, %c0_27], %46 {strides = array<i32>} : memref<200x324xf32, #tpu.memory_space<vmem>>, vector<8x324xf32>,
    %48 = vector.extract_strided_slice %35 {offsets = [0, 19], sizes = [8, 324], strides = [1, 1]} : vector<8x400xf32> to vector<8x324xf32>
    %c48 = arith.constant 48 : index
    %c0_28 = arith.constant 0 : index
    %49 = vector.load %arg8[%c48, %c0_28] : memref<200x324xf32, #tpu.memory_space<vmem>>, vector<8x324xf32>
    tpu.vector_store %arg8[%c48, %c0_28], %48 {strides = array<i32>} : memref<200x324xf32, #tpu.memory_space<vmem>>, vector<8x324xf32>,
    %50 = vector.extract_strided_slice %35 {offsets = [0, 20], sizes = [8, 324], strides = [1, 1]} : vector<8x400xf32> to vector<8x324xf32>
    %c56 = arith.constant 56 : index
    %c0_29 = arith.constant 0 : index
    %51 = vector.load %arg8[%c56, %c0_29] : memref<200x324xf32, #tpu.memory_space<vmem>>, vector<8x324xf32>
    tpu.vector_store %arg8[%c56, %c0_29], %50 {strides = array<i32>} : memref<200x324xf32, #tpu.memory_space<vmem>>, vector<8x324xf32>,
    %52 = vector.extract_strided_slice %35 {offsets = [0, 21], sizes = [8, 324], strides = [1, 1]} : vector<8x400xf32> to vector<8x324xf32>
    %c64 = arith.constant 64 : index
    %c0_30 = arith.constant 0 : index
    %53 = vector.load %arg8[%c64, %c0_30] : memref<200x324xf32, #tpu.memory_space<vmem>>, vector<8x324xf32>
    tpu.vector_store %arg8[%c64, %c0_30], %52 {strides = array<i32>} : memref<200x324xf32, #tpu.memory_space<vmem>>, vector<8x324xf32>,
    %54 = vector.extract_strided_slice %35 {offsets = [0, 22], sizes = [8, 324], strides = [1, 1]} : vector<8x400xf32> to vector<8x324xf32>
    %c72 = arith.constant 72 : index
    %c0_31 = arith.constant 0 : index
    %55 = vector.load %arg8[%c72, %c0_31] : memref<200x324xf32, #tpu.memory_space<vmem>>, vector<8x324xf32>
    tpu.vector_store %arg8[%c72, %c0_31], %54 {strides = array<i32>} : memref<200x324xf32, #tpu.memory_space<vmem>>, vector<8x324xf32>,
    %56 = vector.extract_strided_slice %35 {offsets = [0, 36], sizes = [8, 324], strides = [1, 1]} : vector<8x400xf32> to vector<8x324xf32>
    %c80 = arith.constant 80 : index
    %c0_32 = arith.constant 0 : index
    %57 = vector.load %arg8[%c80, %c0_32] : memref<200x324xf32, #tpu.memory_space<vmem>>, vector<8x324xf32>
    tpu.vector_store %arg8[%c80, %c0_32], %56 {strides = array<i32>} : memref<200x324xf32, #tpu.memory_space<vmem>>, vector<8x324xf32>,
    %58 = vector.extract_strided_slice %35 {offsets = [0, 37], sizes = [8, 324], strides = [1, 1]} : vector<8x400xf32> to vector<8x324xf32>
    %c88 = arith.constant 88 : index
    %c0_33 = arith.constant 0 : index
    %59 = vector.load %arg8[%c88, %c0_33] : memref<200x324xf32, #tpu.memory_space<vmem>>, vector<8x324xf32>
    tpu.vector_store %arg8[%c88, %c0_33], %58 {strides = array<i32>} : memref<200x324xf32, #tpu.memory_space<vmem>>, vector<8x324xf32>,
    %60 = vector.extract_strided_slice %35 {offsets = [0, 38], sizes = [8, 324], strides = [1, 1]} : vector<8x400xf32> to vector<8x324xf32>
    %c96 = arith.constant 96 : index
    %c0_34 = arith.constant 0 : index
    %61 = vector.load %arg8[%c96, %c0_34] : memref<200x324xf32, #tpu.memory_space<vmem>>, vector<8x324xf32>
    tpu.vector_store %arg8[%c96, %c0_34], %60 {strides = array<i32>} : memref<200x324xf32, #tpu.memory_space<vmem>>, vector<8x324xf32>,
    %62 = vector.extract_strided_slice %35 {offsets = [0, 39], sizes = [8, 324], strides = [1, 1]} : vector<8x400xf32> to vector<8x324xf32>
    %c104 = arith.constant 104 : index
    %c0_35 = arith.constant 0 : index
    %63 = vector.load %arg8[%c104, %c0_35] : memref<200x324xf32, #tpu.memory_space<vmem>>, vector<8x324xf32>
    tpu.vector_store %arg8[%c104, %c0_35], %62 {strides = array<i32>} : memref<200x324xf32, #tpu.memory_space<vmem>>, vector<8x324xf32>,
    %64 = vector.extract_strided_slice %35 {offsets = [0, 40], sizes = [8, 324], strides = [1, 1]} : vector<8x400xf32> to vector<8x324xf32>
    %c112 = arith.constant 112 : index
    %c0_36 = arith.constant 0 : index
    %65 = vector.load %arg8[%c112, %c0_36] : memref<200x324xf32, #tpu.memory_space<vmem>>, vector<8x324xf32>
    tpu.vector_store %arg8[%c112, %c0_36], %64 {strides = array<i32>} : memref<200x324xf32, #tpu.memory_space<vmem>>, vector<8x324xf32>,
    %66 = vector.extract_strided_slice %35 {offsets = [0, 54], sizes = [8, 324], strides = [1, 1]} : vector<8x400xf32> to vector<8x324xf32>
    %c120 = arith.constant 120 : index
    %c0_37 = arith.constant 0 : index
    %67 = vector.load %arg8[%c120, %c0_37] : memref<200x324xf32, #tpu.memory_space<vmem>>, vector<8x324xf32>
    tpu.vector_store %arg8[%c120, %c0_37], %66 {strides = array<i32>} : memref<200x324xf32, #tpu.memory_space<vmem>>, vector<8x324xf32>,
    %68 = vector.extract_strided_slice %35 {offsets = [0, 55], sizes = [8, 324], strides = [1, 1]} : vector<8x400xf32> to vector<8x324xf32>
    %c128 = arith.constant 128 : index
    %c0_38 = arith.constant 0 : index
    %69 = vector.load %arg8[%c128, %c0_38] : memref<200x324xf32, #tpu.memory_space<vmem>>, vector<8x324xf32>
    tpu.vector_store %arg8[%c128, %c0_38], %68 {strides = array<i32>} : memref<200x324xf32, #tpu.memory_space<vmem>>, vector<8x324xf32>,
    %70 = vector.extract_strided_slice %35 {offsets = [0, 56], sizes = [8, 324], strides = [1, 1]} : vector<8x400xf32> to vector<8x324xf32>
    %c136 = arith.constant 136 : index
    %c0_39 = arith.constant 0 : index
    %71 = vector.load %arg8[%c136, %c0_39] : memref<200x324xf32, #tpu.memory_space<vmem>>, vector<8x324xf32>
    tpu.vector_store %arg8[%c136, %c0_39], %70 {strides = array<i32>} : memref<200x324xf32, #tpu.memory_space<vmem>>, vector<8x324xf32>,
    %72 = vector.extract_strided_slice %35 {offsets = [0, 57], sizes = [8, 324], strides = [1, 1]} : vector<8x400xf32> to vector<8x324xf32>
    %c144 = arith.constant 144 : index
    %c0_40 = arith.constant 0 : index
    %73 = vector.load %arg8[%c144, %c0_40] : memref<200x324xf32, #tpu.memory_space<vmem>>, vector<8x324xf32>
    tpu.vector_store %arg8[%c144, %c0_40], %72 {strides = array<i32>} : memref<200x324xf32, #tpu.memory_space<vmem>>, vector<8x324xf32>,
    %74 = vector.extract_strided_slice %35 {offsets = [0, 58], sizes = [8, 324], strides = [1, 1]} : vector<8x400xf32> to vector<8x324xf32>
    %c152 = arith.constant 152 : index
    %c0_41 = arith.constant 0 : index
    %75 = vector.load %arg8[%c152, %c0_41] : memref<200x324xf32, #tpu.memory_space<vmem>>, vector<8x324xf32>
    tpu.vector_store %arg8[%c152, %c0_41], %74 {strides = array<i32>} : memref<200x324xf32, #tpu.memory_space<vmem>>, vector<8x324xf32>,
    %76 = vector.extract_strided_slice %35 {offsets = [0, 72], sizes = [8, 324], strides = [1, 1]} : vector<8x400xf32> to vector<8x324xf32>
    %c160 = arith.constant 160 : index
    %c0_42 = arith.constant 0 : index
    %77 = vector.load %arg8[%c160, %c0_42] : memref<200x324xf32, #tpu.memory_space<vmem>>, vector<8x324xf32>
    tpu.vector_store %arg8[%c160, %c0_42], %76 {strides = array<i32>} : memref<200x324xf32, #tpu.memory_space<vmem>>, vector<8x324xf32>,
    %78 = vector.extract_strided_slice %35 {offsets = [0, 73], sizes = [8, 324], strides = [1, 1]} : vector<8x400xf32> to vector<8x324xf32>
    %c168 = arith.constant 168 : index
    %c0_43 = arith.constant 0 : index
    %79 = vector.load %arg8[%c168, %c0_43] : memref<200x324xf32, #tpu.memory_space<vmem>>, vector<8x324xf32>
    tpu.vector_store %arg8[%c168, %c0_43], %78 {strides = array<i32>} : memref<200x324xf32, #tpu.memory_space<vmem>>, vector<8x324xf32>,
    %80 = vector.extract_strided_slice %35 {offsets = [0, 74], sizes = [8, 324], strides = [1, 1]} : vector<8x400xf32> to vector<8x324xf32>
    %c176 = arith.constant 176 : index
    %c0_44 = arith.constant 0 : index
    %81 = vector.load %arg8[%c176, %c0_44] : memref<200x324xf32, #tpu.memory_space<vmem>>, vector<8x324xf32>
    tpu.vector_store %arg8[%c176, %c0_44], %80 {strides = array<i32>} : memref<200x324xf32, #tpu.memory_space<vmem>>, vector<8x324xf32>,
    %82 = vector.extract_strided_slice %35 {offsets = [0, 75], sizes = [8, 324], strides = [1, 1]} : vector<8x400xf32> to vector<8x324xf32>
    %c184 = arith.constant 184 : index
    %c0_45 = arith.constant 0 : index
    %83 = vector.load %arg8[%c184, %c0_45] : memref<200x324xf32, #tpu.memory_space<vmem>>, vector<8x324xf32>
    tpu.vector_store %arg8[%c184, %c0_45], %82 {strides = array<i32>} : memref<200x324xf32, #tpu.memory_space<vmem>>, vector<8x324xf32>,
    %84 = vector.extract_strided_slice %35 {offsets = [0, 76], sizes = [8, 324], strides = [1, 1]} : vector<8x400xf32> to vector<8x324xf32>
    %c192 = arith.constant 192 : index
    %c0_46 = arith.constant 0 : index
    %85 = vector.load %arg8[%c192, %c0_46] : memref<200x324xf32, #tpu.memory_space<vmem>>, vector<8x324xf32>
    tpu.vector_store %arg8[%c192, %c0_46], %84 {strides = array<i32>} : memref<200x324xf32, #tpu.memory_space<vmem>>, vector<8x324xf32>,
    %c0_47 = arith.constant 0 : index
    %c0_48 = arith.constant 0 : index
    %86 = vector.load %arg2[%c0_47, %c0_48] : memref<8x200xf32, #tpu.memory_space<vmem>>, vector<8x200xf32>
    %c0_49 = arith.constant 0 : index
    %c0_50 = arith.constant 0 : index
    %87 = vector.load %arg8[%c0_49, %c0_50] : memref<200x324xf32, #tpu.memory_space<vmem>>, vector<200x324xf32>
    %cst_51 = arith.constant dense<0.000000e+00> : vector<8x324xf32>
    %88 = tpu.matmul %86, %87, %cst_51 {dimension_numbers = #tpu.dot_dimension_numbers<[1], [0], [0], [1], [0, 0, 1, 1], [], []>} : vector<8x200xf32>, vector<200x324xf32>, vector<8x324xf32> -> vector<8x324xf32>
    %c0_52 = arith.constant 0 : index
    %c0_53 = arith.constant 0 : index
    %c0_54 = arith.constant 0 : index
    %89 = vector.load %arg3[%c0_52, %c0_53, %c0_54] : memref<3x8x1xf32, #tpu.memory_space<vmem>>, vector<1x8x1xf32>
    %90 = vector.shape_cast %89 : vector<1x8x1xf32> to vector<8x1xf32>
    %91 = vector.broadcast %90 : vector<8x1xf32> to vector<8x324xf32>
    %92 = arith.addf %88, %91 : vector<8x324xf32>
    %cst_55 = arith.constant 0.000000e+00 : f32
    %93 = vector.broadcast %cst_55 : f32 to vector<8x324xf32>
    %94 = arith.maximumf %92, %93 : vector<8x324xf32>
    %c0_56 = arith.constant 0 : index
    %c0_57 = arith.constant 0 : index
    %c0_58 = arith.constant 0 : index
    %95 = vector.load %arg4[%c0_56, %c0_57, %c0_58] : memref<2x8x8xf32, #tpu.memory_space<vmem>>, vector<1x8x8xf32>
    %96 = vector.shape_cast %95 : vector<1x8x8xf32> to vector<8x8xf32>
    %cst_59 = arith.constant dense<0.000000e+00> : vector<8x324xf32>
    %97 = tpu.matmul %96, %94, %cst_59 {dimension_numbers = #tpu.dot_dimension_numbers<[1], [0], [0], [1], [0, 0, 1, 1], [], []>} : vector<8x8xf32>, vector<8x324xf32>, vector<8x324xf32> -> vector<8x324xf32>
    %c1 = arith.constant 1 : index
    %c0_60 = arith.constant 0 : index
    %c0_61 = arith.constant 0 : index
    %98 = vector.load %arg3[%c1, %c0_60, %c0_61] : memref<3x8x1xf32, #tpu.memory_space<vmem>>, vector<1x8x1xf32>
    %99 = vector.shape_cast %98 : vector<1x8x1xf32> to vector<8x1xf32>
    %100 = vector.broadcast %99 : vector<8x1xf32> to vector<8x324xf32>
    %101 = arith.addf %97, %100 : vector<8x324xf32>
    %cst_62 = arith.constant 0.000000e+00 : f32
    %102 = vector.broadcast %cst_62 : f32 to vector<8x324xf32>
    %103 = arith.maximumf %101, %102 : vector<8x324xf32>
    %c1_63 = arith.constant 1 : index
    %c0_64 = arith.constant 0 : index
    %c0_65 = arith.constant 0 : index
    %104 = vector.load %arg4[%c1_63, %c0_64, %c0_65] : memref<2x8x8xf32, #tpu.memory_space<vmem>>, vector<1x8x8xf32>
    %105 = vector.shape_cast %104 : vector<1x8x8xf32> to vector<8x8xf32>
    %cst_66 = arith.constant dense<0.000000e+00> : vector<8x324xf32>
    %106 = tpu.matmul %105, %103, %cst_66 {dimension_numbers = #tpu.dot_dimension_numbers<[1], [0], [0], [1], [0, 0, 1, 1], [], []>} : vector<8x8xf32>, vector<8x324xf32>, vector<8x324xf32> -> vector<8x324xf32>
    %c2 = arith.constant 2 : index
    %c0_67 = arith.constant 0 : index
    %c0_68 = arith.constant 0 : index
    %107 = vector.load %arg3[%c2, %c0_67, %c0_68] : memref<3x8x1xf32, #tpu.memory_space<vmem>>, vector<1x8x1xf32>
    %108 = vector.shape_cast %107 : vector<1x8x1xf32> to vector<8x1xf32>
    %109 = vector.broadcast %108 : vector<8x1xf32> to vector<8x324xf32>
    %110 = arith.addf %106, %109 : vector<8x324xf32>
    %cst_69 = arith.constant 0.000000e+00 : f32
    %111 = vector.broadcast %cst_69 : f32 to vector<8x324xf32>
    %112 = arith.maximumf %110, %111 : vector<8x324xf32>
    %c0_70 = arith.constant 0 : index
    %c0_71 = arith.constant 0 : index
    %c0_72 = arith.constant 0 : index
    %113 = vector.load %arg5[%c0_70, %c0_71, %c0_72] : memref<2x8x324xf32, #tpu.memory_space<vmem>>, vector<1x8x324xf32>
    %114 = vector.shape_cast %113 : vector<1x8x324xf32> to vector<8x324xf32>
    %115 = arith.mulf %114, %112 : vector<8x324xf32>
    %c1_73 = arith.constant 1 : index
    %c0_74 = arith.constant 0 : index
    %c0_75 = arith.constant 0 : index
    %116 = vector.load %arg5[%c1_73, %c0_74, %c0_75] : memref<2x8x324xf32, #tpu.memory_space<vmem>>, vector<1x8x324xf32>
    %117 = vector.shape_cast %116 : vector<1x8x324xf32> to vector<8x324xf32>
    %118 = arith.addf %115, %117 : vector<8x324xf32>
    %c0_76 = arith.constant 0 : index
    %c0_77 = arith.constant 0 : index
    %119 = vector.load %arg6[%c0_76, %c0_77] : memref<8x324xf32, #tpu.memory_space<vmem>>, vector<8x324xf32>
    tpu.vector_store %arg6[%c0_76, %c0_77], %118 {strides = array<i32>} : memref<8x324xf32, #tpu.memory_space<vmem>>, vector<8x324xf32>,
    return
  }
  func.func @transform_0(%arg0: i32) -> (i32, i32) {
    %c0_i32 = arith.constant 0 : i32
    %c0_i32_0 = arith.constant 0 : i32
    %c0_i32_1 = arith.constant 0 : i32
    return %c0_i32, %c0_i32_0 : i32, i32
  }
  func.func @transform_1(%arg0: i32) -> (i32, i32) {
    %c0_i32 = arith.constant 0 : i32
    %c0_i32_0 = arith.constant 0 : i32
    %c0_i32_1 = arith.constant 0 : i32
    return %c0_i32, %c0_i32_0 : i32, i32
  }
  func.func @transform_2(%arg0: i32) -> (i32, i32, i32) {
    %c0_i32 = arith.constant 0 : i32
    %c0_i32_0 = arith.constant 0 : i32
    %c0_i32_1 = arith.constant 0 : i32
    %c0_i32_2 = arith.constant 0 : i32
    return %c0_i32, %c0_i32_0, %c0_i32_1 : i32, i32, i32
  }
  func.func @transform_3(%arg0: i32) -> (i32, i32, i32) {
    %c0_i32 = arith.constant 0 : i32
    %c0_i32_0 = arith.constant 0 : i32
    %c0_i32_1 = arith.constant 0 : i32
    %c0_i32_2 = arith.constant 0 : i32
    return %c0_i32, %c0_i32_0, %c0_i32_1 : i32, i32, i32
  }
  func.func @transform_4(%arg0: i32) -> (i32, i32, i32) {
    %c0_i32 = arith.constant 0 : i32
    %c0_i32_0 = arith.constant 0 : i32
    %c0_i32_1 = arith.constant 0 : i32
    %c0_i32_2 = arith.constant 0 : i32
    return %c0_i32, %c0_i32_0, %c0_i32_1 : i32, i32, i32
  }
  func.func @transform_5(%arg0: i32) -> (i32, i32) {
    %c0_i32 = arith.constant 0 : i32
    %c0_i32_0 = arith.constant 0 : i32
    %c0_i32_1 = arith.constant 0 : i32
    return %c0_i32, %c0_i32_0 : i32, i32
  }
}

</mosaic_0001>

<bundles_post_ra>
// kernel: fcn_forward.1
= control target key start
LH: loop header
LB: loop body
LE: loop exit
PB: predicated region body
PF: predicated region fallthrough
CT: control target
= control target key end

     0   :  { %v1129_v1 = vmov 0.0   ;;  %s1130_s20 = smov 69   ;;  %s1131_s21 = smov 65   ;;  %vm51_vm0 = vcmask 138248   ;;  %vm56_vm1 = vcmask 285848   ;;  %vm61_vm2 = vcmask 433448   ;;  %s1617_s0 = inlined_call_operand.vmem [shape: f32[8,256], index: 0, kind: input, shape index: {}]   ;;  %s1618_s1 = inlined_call_operand.vmem [shape: f32[8,200], index: 1, kind: input, shape index: {}]   ;;  %s1619_s2 = inlined_call_operand.vmem [shape: f32[3,8,1], index: 2, kind: input, shape index: {}]   ;;  %s1620_s3 = inlined_call_operand.vmem [shape: f32[2,8,8], index: 3, kind: input, shape index: {}]   ;;  %s1621_s4 = inlined_call_operand.vmem [shape: f32[2,8,324], index: 4, kind: input, shape index: {}]   ;;  %s1622_s5 = inlined_call_operand.vmem [shape: f32[8,324], index: 5, kind: output, shape index: {}]  }
   0x1   :  { %v25_v0 = vld [vmem:[%s1617_s0] sm:$0xff]  ;;  %21 = vst [vmem:[#allocation2 + $0x8] sm:$0xff] %v1129_v1  ;;  %20 = vst [vmem:[#allocation2] sm:$0xff] %v1129_v1  ;;  %655 = vmatprep.subr.mxu1 %v1129_v1  ;;  %s1132_s22 = smov 71   ;;  %s1133_s23 = smov 67   ;;  %v26_v2 = vld [vmem:[%s1617_s0 + $0x8] sm:$0xff] }
   0x2   :  { %22 = vst [vmem:[#allocation2 + $0x10] sm:$0xff] %v1129_v1  ;;  %58 = vrot.lane.b32.xlu1 %v25_v0, %s1130_s20  ;;  %48 = vrot.lane.b32.xlu0 %v25_v0, %s1131_s21  ;;  %s1134_s26 = smov 73   ;;  %s1135_s27 = smov 79   ;;  %vm66_vm3 = vcmask 581048   ;;  %vm72_vm4 = vcmask 728648   ;;  %vm89_vm5 = vcmask 121856  }
   0x3   :  { %s1136_s28 = smov 57   ;;  %s1137_s29 = smov 81   ;;  %vm31_vm6 = vcmask 597448   ;;  %vm94_vm7 = vcmask 269448   ;;  %vm99_vm8 = vcmask 417048   ;;  %vm77_vm9 = vcmask 876248  }
   0x4   :  { %s1138_s30 = smov 83   ;;  %s1139_s6 = smov 75   ;;  %vm82_vm10 = vcmask 1023848   ;;  %vm36_vm11 = vcmask 745048   ;;  %vm87_vm12 = vcmask 1048568   ;;  %vm23_vm13 = vcmask 130048  }
   0x5   :  { %s1140_s7 = smov 77   ;;  %s1141_s8 = smov 59   ;;  %24 = vst.msk [vmem:[#allocation2 + $0x18] sm:$0xff] %vm23_vm13, %v1129_v1  ;;  %vm41_vm14 = vcmask 892648   ;;  %vm104_vm15 = vcmask 564648   ;;  %v499_v35 = vld [vmem:[%s1618_s1 + $0x8] sm:$0xff] }
   0x6   :  { %63 = vrot.lane.b32.xlu1 %v25_v0, %s1132_s22  ;;  %53 = vrot.lane.b32.xlu0 %v25_v0, %s1133_s23  ;;  %s1142_s9 = smov 61   ;;  %s1143_s0 = smov 85   ;;  %v1168_v50 = vmov 0   ;;  %v575_v51 = vld [vmem:[%s1619_s2] sm:$0xff]  ;;  %v1066_v53 = vld [vmem:[%s1619_s2 + $0x10] sm:$0xff]  ;;  %vm218_vm13 = vcmask 883712  }
   0x7   :  { %s1144_s10 = smov 63   ;;  %s1145_s11 = smov 87   ;;  %1127 = vset.pattern.permute.xlu1 %v1168_v50  ;;  %1128 = vset.pattern.permute.xlu0 %v1168_v50 }
   0x8   :  { %s1146_s12 = smov 88   ;;  %s1147_s13 = smov 74  }
   0x9   :  { %s1148_s14 = smov 90   ;;  %s1149_s15 = smov 89  }
   0xa   :  { %69 = vrot.lane.b32.xlu1 %v26_v2, %s1134_s26  ;;  %84 = vrot.lane.b32.xlu0 %v26_v2, %s1135_s27  ;;  %s1150_s16 = smov 92   ;;  %s1151_s17 = smov 91  }
   0xb   :  { %s1152_s18 = smov 107   ;;  %s1153_s19 = smov 106  }
   0xc   :  { %s1154_s20 = smov 109   ;;  %s1155_s21 = smov 108   ;;  %v114_v24 = vld [vmem:[#allocation2 + $0x18] sm:$0xff] }
   0xd   :  { %s1156_s23 = smov 124   ;;  %s1157_s24 = smov 110  }
   0xe   :  { %28 = vrot.lane.b32.xlu1 %v25_v0, %s1136_s28  ;;  %91 = vrot.lane.b32.xlu0 %v26_v2, %s1137_s29  ;;  %s1158_s25 = smov 126   ;;  %s1159_s27 = smov 125  }
   0xf   :  { %s1160_s28 = smov 52   ;;  %s1161_s29 = smov 127  }
  0x12   :  { %96 = vrot.lane.b32.xlu1 %v26_v2, %s1138_s30  ;;  %74 = vrot.lane.b32.xlu0 %v26_v2, %s1139_s6  ;;  %s1162_s30 = smov 53   ;;  %s1163_s6 = smov 54  }
  0x16   :  { %79 = vrot.lane.b32.xlu1 %v26_v2, %s1140_s7  ;;  %33 = vrot.lane.b32.xlu0 %v25_v0, %s1141_s8  ;;  %s1164_s7 = smov 55   ;;  %s1165_s8 = smov 56  }
  0x1a   :  { %38 = vrot.lane.b32.xlu1 %v25_v0, %s1142_s9  ;;  %101 = vrot.lane.b32.xlu0 %v26_v2, %s1143_s0  ;;  %s1166_s9 = smov 70   ;;  %s1167_s0 = smov 72  }
  0x1e   :  { %43 = vrot.lane.b32.xlu1 %v25_v0, %s1144_s10  ;;  %106 = vrot.lane.b32.xlu0 %v26_v2, %s1145_s11 }
  0x74   :  { %v59_v3 = vpop.permute.xlu1 %58  ;;  %v49_v4 = vpop.permute.xlu0 %48 }
  0x75   :  { %52 = vst.msk [vmem:[#allocation2 + $0x8] sm:$0xff] %vm51_vm0, %v49_v4  ;;  %vm46_vm0 = vcmask 1040248  }
  0x78   :  { %v64_v5 = vpop.permute.xlu1 %63  ;;  %v54_v6 = vpop.permute.xlu0 %53 }
  0x79   :  { %57 = vst.msk [vmem:[#allocation2 + $0x8] sm:$0xff] %vm56_vm1, %v54_v6  ;;  %vm109_vm1 = vcmask 712248  }
  0x7a   :  { %62 = vst.msk [vmem:[#allocation2 + $0x8] sm:$0xff] %vm61_vm2, %v59_v3  ;;  %vm117_vm2 = vcmask 556032  }
  0x7b   :  { %67 = vst.msk [vmem:[#allocation2 + $0x8] sm:$0xff] %vm66_vm3, %v64_v5  ;;  %vm368_vm3 = vcmask 588800  }
  0x7c   :  { %v70_v7 = vpop.permute.xlu1 %69  ;;  %v85_v8 = vpop.permute.xlu0 %84  ;;  %1060 = vmatprep.mubr.msk.f32.mxu0 %vm368_vm3, %v499_v35  ;;  %1061 = vmatprep.mubr.msk.f32.mxu1 %vm368_vm3, %v499_v35 }
  0x7d   :  { %73 = vst.msk [vmem:[#allocation2 + $0x8] sm:$0xff] %vm72_vm4, %v70_v7  ;;  %vm323_vm4 = vcmask 719872  }
  0x7e   :  { %90 = vst.msk [vmem:[#allocation2 + $0x10] sm:$0xff] %vm89_vm5, %v85_v8  ;;  %vm338_vm5 = vcmask 605184  }
  0x80   :  { %v29_v9 = vpop.permute.xlu1 %28  ;;  %v92_v10 = vpop.permute.xlu0 %91 }
  0x81   :  { %32 = vst.msk [vmem:[#allocation2] sm:$0xff] %vm31_vm6, %v29_v9  ;;  %vm293_vm6 = vcmask 736256  }
  0x82   :  { %95 = vst.msk [vmem:[#allocation2 + $0x10] sm:$0xff] %vm94_vm7, %v92_v10  ;;  %vm308_vm7 = vcmask 728064  }
  0x84   :  { %v97_v11 = vpop.permute.xlu1 %96  ;;  %v75_v12 = vpop.permute.xlu0 %74 }
  0x85   :  { %100 = vst.msk [vmem:[#allocation2 + $0x10] sm:$0xff] %vm99_vm8, %v97_v11  ;;  %vm263_vm8 = vcmask 752640  }
  0x86   :  { %78 = vst.msk [vmem:[#allocation2 + $0x8] sm:$0xff] %vm77_vm9, %v75_v12  ;;  %vm278_vm9 = vcmask 744448  }
  0x88   :  { %v80_v13 = vpop.permute.xlu1 %79  ;;  %v34_v14 = vpop.permute.xlu0 %33 }
  0x89   :  { %83 = vst.msk [vmem:[#allocation2 + $0x8] sm:$0xff] %vm82_vm10, %v80_v13  ;;  %vm233_vm10 = vcmask 875520  }
  0x8a   :  { %37 = vst.msk [vmem:[#allocation2] sm:$0xff] %vm36_vm11, %v34_v14  ;;  %vm248_vm11 = vcmask 867328  }
  0x8b   :  { %88 = vst.msk [vmem:[#allocation2 + $0x8] sm:$0xff] %vm87_vm12, %v85_v8  ;;  %vm203_vm12 = vcmask 891904  }
  0x8c   :  { %v39_v15 = vpop.permute.xlu1 %38  ;;  %v102_v16 = vpop.permute.xlu0 %101 }
  0x8d   :  { %42 = vst.msk [vmem:[#allocation2] sm:$0xff] %vm41_vm14, %v39_v15  ;;  %vm173_vm14 = vcmask 1014784  }
  0x8e   :  { %105 = vst.msk [vmem:[#allocation2 + $0x10] sm:$0xff] %vm104_vm15, %v102_v16  ;;  %vm188_vm15 = vcmask 900096  }
  0x90   :  { %v44_v17 = vpop.permute.xlu1 %43  ;;  %v107_v18 = vpop.permute.xlu0 %106 }
  0x91   :  { %47 = vst.msk [vmem:[#allocation2] sm:$0xff] %vm46_vm0, %v44_v17  ;;  %vm143_vm0 = vcmask 1031168  }
  0x92   :  { %v1213_v19 = vld [vmem:[#allocation2 + $0x8] sm:$0xff]  ;;  %110 = vst.msk [vmem:[#allocation2 + $0x10] sm:$0xff] %vm109_vm1, %v107_v18  ;;  %vm158_vm1 = vcmask 1022976  }
  0x98   :  { %v1215_v20 = vld [vmem:[#allocation2] sm:$0xff] }
  0x99   :  { %v1217_v21 = vld [vmem:[#allocation2 + $0x10] sm:$0xff]  ;;  %317 = vrot.lane.b32.xlu1 %v1215_v20, %s1146_s12  ;;  %332 = vrot.lane.b32.xlu0 %v1215_v20, %s1147_s13 }
  0x9a   :  { %118 = vst.msk [vmem:[#allocation3 + $0x10] sm:$0xff] %vm117_vm2, %v1217_v21 }
  0x9d   :  { %287 = vrot.lane.b32.xlu1 %v1215_v20, %s1148_s14  ;;  %302 = vrot.lane.b32.xlu0 %v1215_v20, %s1149_s15 }
  0xa1   :  { %257 = vrot.lane.b32.xlu1 %v1215_v20, %s1150_s16  ;;  %272 = vrot.lane.b32.xlu0 %v1215_v20, %s1151_s17 }
  0xa5   :  { %227 = vrot.lane.b32.xlu1 %v1215_v20, %s1152_s18  ;;  %242 = vrot.lane.b32.xlu0 %v1215_v20, %s1153_s19 }
  0xa9   :  { %197 = vrot.lane.b32.xlu1 %v1215_v20, %s1154_s20  ;;  %212 = vrot.lane.b32.xlu0 %v1215_v20, %s1155_s21 }
  0xad   :  { %167 = vrot.lane.b32.xlu1 %v1215_v20, %s1156_s23  ;;  %182 = vrot.lane.b32.xlu0 %v1215_v20, %s1157_s24 }
  0xb1   :  { %137 = vrot.lane.b32.xlu1 %v1215_v20, %s1158_s25  ;;  %152 = vrot.lane.b32.xlu0 %v1215_v20, %s1159_s27 }
  0xb5   :  { %480 = vrot.lane.b32.xlu1 %v1215_v20, %s1160_s28  ;;  %122 = vrot.lane.b32.xlu0 %v1215_v20, %s1161_s29 }
  0xb9   :  { %462 = vrot.lane.b32.xlu0 %v1215_v20, %s1162_s30  ;;  %336 = vrot.lane.b32.xlu1 %v1217_v21, %s1147_s13 }
  0xbd   :  { %321 = vrot.lane.b32.xlu0 %v1217_v21, %s1146_s12  ;;  %306 = vrot.lane.b32.xlu1 %v1217_v21, %s1149_s15 }
  0xc1   :  { %291 = vrot.lane.b32.xlu0 %v1217_v21, %s1148_s14  ;;  %276 = vrot.lane.b32.xlu1 %v1217_v21, %s1151_s17 }
  0xc5   :  { %261 = vrot.lane.b32.xlu0 %v1217_v21, %s1150_s16  ;;  %246 = vrot.lane.b32.xlu1 %v1217_v21, %s1153_s19 }
  0xc9   :  { %231 = vrot.lane.b32.xlu0 %v1217_v21, %s1152_s18  ;;  %216 = vrot.lane.b32.xlu1 %v1217_v21, %s1155_s21 }
  0xcd   :  { %201 = vrot.lane.b32.xlu0 %v1217_v21, %s1154_s20  ;;  %186 = vrot.lane.b32.xlu1 %v1217_v21, %s1157_s24 }
  0xd1   :  { %171 = vrot.lane.b32.xlu0 %v1217_v21, %s1156_s23  ;;  %156 = vrot.lane.b32.xlu1 %v1217_v21, %s1159_s27 }
  0xd5   :  { %141 = vrot.lane.b32.xlu0 %v1217_v21, %s1158_s25  ;;  %126 = vrot.lane.b32.xlu1 %v1217_v21, %s1161_s29 }
  0xd9   :  { %484 = vrot.lane.b32.xlu0 %v1217_v21, %s1160_s28  ;;  %466 = vrot.lane.b32.xlu1 %v1217_v21, %s1162_s30 }
  0xdd   :  { %334 = vrot.lane.b32.xlu0 %v1213_v19, %s1147_s13  ;;  %319 = vrot.lane.b32.xlu1 %v1213_v19, %s1146_s12 }
  0xe1   :  { %304 = vrot.lane.b32.xlu0 %v1213_v19, %s1149_s15  ;;  %289 = vrot.lane.b32.xlu1 %v1213_v19, %s1148_s14 }
  0xe5   :  { %274 = vrot.lane.b32.xlu0 %v1213_v19, %s1151_s17  ;;  %259 = vrot.lane.b32.xlu1 %v1213_v19, %s1150_s16 }
  0xe9   :  { %244 = vrot.lane.b32.xlu0 %v1213_v19, %s1153_s19  ;;  %229 = vrot.lane.b32.xlu1 %v1213_v19, %s1152_s18 }
  0xed   :  { %214 = vrot.lane.b32.xlu0 %v1213_v19, %s1155_s21  ;;  %199 = vrot.lane.b32.xlu1 %v1213_v19, %s1154_s20 }
  0xf1   :  { %184 = vrot.lane.b32.xlu0 %v1213_v19, %s1157_s24  ;;  %169 = vrot.lane.b32.xlu1 %v1213_v19, %s1156_s23 }
  0xf5   :  { %154 = vrot.lane.b32.xlu0 %v1213_v19, %s1159_s27  ;;  %139 = vrot.lane.b32.xlu1 %v1213_v19, %s1158_s25 }
  0xf9   :  { %124 = vrot.lane.b32.xlu0 %v1213_v19, %s1161_s29  ;;  %482 = vrot.lane.b32.xlu1 %v1213_v19, %s1160_s28 }
  0xfd   :  { %464 = vrot.lane.b32.xlu0 %v1213_v19, %s1162_s30  ;;  %446 = vrot.lane.b32.xlu1 %v1213_v19, %s1163_s6 }
 0x101   :  { %448 = vrot.lane.b32.xlu0 %v1217_v21, %s1163_s6  ;;  %444 = vrot.lane.b32.xlu1 %v1215_v20, %s1163_s6 }
 0x105   :  { %428 = vrot.lane.b32.xlu0 %v1213_v19, %s1164_s7  ;;  %430 = vrot.lane.b32.xlu1 %v1217_v21, %s1164_s7 }
 0x109   :  { %426 = vrot.lane.b32.xlu0 %v1215_v20, %s1164_s7  ;;  %410 = vrot.lane.b32.xlu1 %v1213_v19, %s1165_s8 }
 0x10b   :  { %v1337_v22 = vpop.permute.xlu1 %317  ;;  %v1339_v23 = vpop.permute.xlu0 %332 }
 0x10d   :  { %412 = vrot.lane.b32.xlu0 %v1217_v21, %s1165_s8  ;;  %408 = vrot.lane.b32.xlu1 %v1215_v20, %s1165_s8 }
 0x10f   :  { %v1345_v25 = vpop.permute.xlu1 %287  ;;  %v1347_v26 = vpop.permute.xlu0 %302 }
 0x111   :  { %486 = vrot.lane.b32.xlu0 %v114_v24, %s1160_s28  ;;  %394 = vrot.lane.b32.xlu1 %v1213_v19, %s1166_s9 }
 0x113   :  { %v1351_v27 = vpop.permute.xlu1 %257  ;;  %v1353_v28 = vpop.permute.xlu0 %272 }
 0x115   :  { %396 = vrot.lane.b32.xlu0 %v1217_v21, %s1166_s9  ;;  %392 = vrot.lane.b32.xlu1 %v1215_v20, %s1166_s9 }
 0x117   :  { %v1357_v29 = vpop.permute.xlu1 %227  ;;  %v1359_v30 = vpop.permute.xlu0 %242 }
 0x119   :  { %468 = vrot.lane.b32.xlu0 %v114_v24, %s1162_s30  ;;  %379 = vrot.lane.b32.xlu1 %v1213_v19, %s1132_s22 }
 0x11b   :  { %v1364_v31 = vpop.permute.xlu1 %197  ;;  %v1366_v32 = vpop.permute.xlu0 %212 }
 0x11d   :  { %381 = vrot.lane.b32.xlu0 %v1217_v21, %s1132_s22  ;;  %377 = vrot.lane.b32.xlu1 %v1215_v20, %s1132_s22 }
 0x11f   :  { %v1372_v33 = vpop.permute.xlu1 %167  ;;  %v1374_v34 = vpop.permute.xlu0 %182 }
 0x121   :  { %450 = vrot.lane.b32.xlu0 %v114_v24, %s1163_s6  ;;  %364 = vrot.lane.b32.xlu1 %v1213_v19, %s1167_s0 }
 0x123   :  { %v1381_v36 = vpop.permute.xlu1 %137  ;;  %v1383_v37 = vpop.permute.xlu0 %152 }
 0x125   :  { %366 = vrot.lane.b32.xlu0 %v1217_v21, %s1167_s0  ;;  %362 = vrot.lane.b32.xlu1 %v1215_v20, %s1167_s0 }
 0x127   :  { %v1389_v38 = vpop.permute.xlu1 %480  ;;  %v1391_v39 = vpop.permute.xlu0 %122 }
 0x129   :  { %432 = vrot.lane.b32.xlu0 %v114_v24, %s1164_s7  ;;  %349 = vrot.lane.b32.xlu1 %v1213_v19, %s1134_s26 }
 0x12b   :  { %v1396_v40 = vpop.permute.xlu1 %336  ;;  %v1398_v41 = vpop.permute.xlu0 %462 }
 0x12c   :  { %346 = vst.msk [vmem:[#allocation3 + $0x178] sm:$0xff] %vm117_vm2, %v1396_v40 }
 0x12d   :  { %351 = vrot.lane.b32.xlu0 %v1217_v21, %s1134_s26  ;;  %347 = vrot.lane.b32.xlu1 %v1215_v20, %s1134_s26 }
 0x12f   :  { %v1406_v42 = vpop.permute.xlu1 %306  ;;  %v1408_v43 = vpop.permute.xlu0 %321 }
 0x130   :  { %316 = vst.msk [vmem:[#allocation3 + $0x148] sm:$0xff] %vm117_vm2, %v1406_v42  ;;  %331 = vst.msk [vmem:[#allocation3 + $0x160] sm:$0xff] %vm117_vm2, %v1408_v43 }
 0x131   :  { %414 = vrot.lane.b32.xlu0 %v114_v24, %s1165_s8  ;;  %578 = vperm.xlu1 %1127, %v575_v51  }
 0x133   :  { %v1415_v44 = vpop.permute.xlu1 %276  ;;  %v1417_v45 = vpop.permute.xlu0 %291  ;;  %v547_v46 = vld [vmem:[#allocation3 + $0x178] sm:$0xff] }
 0x134   :  { %286 = vst.msk [vmem:[#allocation3 + $0x118] sm:$0xff] %vm117_vm2, %v1415_v44  ;;  %301 = vst.msk [vmem:[#allocation3 + $0x130] sm:$0xff] %vm117_vm2, %v1417_v45  ;;  %656 = vmatpush1.msra.mxu1 %v547_v46 }
 0x135   :  { %657 = vmatprep.subr.mxu1 %v1129_v1  ;;  %890 = vperm.xlu1 %1127, %v1066_v53  }
 0x137   :  { %v1424_v47 = vpop.permute.xlu1 %246  ;;  %v1426_v48 = vpop.permute.xlu0 %261  ;;  %v544_v49 = vld [vmem:[#allocation3 + $0x160] sm:$0xff]  ;;  %v541_v52 = vld [vmem:[#allocation3 + $0x148] sm:$0xff] }
 0x138   :  { %256 = vst.msk [vmem:[#allocation3 + $0xe8] sm:$0xff] %vm117_vm2, %v1424_v47  ;;  %271 = vst.msk [vmem:[#allocation3 + $0x100] sm:$0xff] %vm117_vm2, %v1426_v48  ;;  %658 = vmatpush1.msra.mxu1 %v544_v49 }
 0x139   :  { %659 = vmatprep.subr.mxu1 %v1129_v1 }
 0x13a   :  { %660 = vmatpush1.msra.mxu1 %v541_v52 }
 0x13b   :  { %v1439_v54 = vpop.permute.xlu1 %216  ;;  %661 = vmatprep.subr.mxu1 %v1129_v1  ;;  %v1442_v55 = vpop.permute.xlu0 %231  ;;  %v538_v56 = vld [vmem:[#allocation3 + $0x130] sm:$0xff]  ;;  %v535_v57 = vld [vmem:[#allocation3 + $0x118] sm:$0xff] }
 0x13c   :  { %226 = vst.msk [vmem:[#allocation3 + $0xb8] sm:$0xff] %vm117_vm2, %v1439_v54  ;;  %241 = vst.msk [vmem:[#allocation3 + $0xd0] sm:$0xff] %vm117_vm2, %v1442_v55  ;;  %662 = vmatpush1.msra.mxu1 %v538_v56 }
 0x13d   :  { %663 = vmatprep.subr.mxu1 %v1129_v1 }
 0x13e   :  { %664 = vmatpush1.msra.mxu1 %v535_v57 }
 0x13f   :  { %v1449_v58 = vpop.permute.xlu1 %186  ;;  %665 = vmatprep.subr.mxu1 %v1129_v1  ;;  %v1452_v59 = vpop.permute.xlu0 %201  ;;  %v532_v60 = vld [vmem:[#allocation3 + $0x100] sm:$0xff]  ;;  %v529_v61 = vld [vmem:[#allocation3 + $0xe8] sm:$0xff] }
 0x140   :  { %196 = vst.msk [vmem:[#allocation3 + $0x88] sm:$0xff] %vm117_vm2, %v1449_v58  ;;  %211 = vst.msk [vmem:[#allocation3 + $0xa0] sm:$0xff] %vm117_vm2, %v1452_v59  ;;  %666 = vmatpush1.msra.mxu1 %v532_v60 }
 0x141   :  { %667 = vmatprep.subr.mxu1 %v1129_v1 }
 0x142   :  { %668 = vmatpush1.msra.mxu1 %v529_v61 }
 0x143   :  { %v1459_v62 = vpop.permute.xlu1 %156  ;;  %669 = vmatprep.subr.mxu1 %v1129_v1  ;;  %v1462_v63 = vpop.permute.xlu0 %171  ;;  %v526_v0 = vld [vmem:[#allocation3 + $0xd0] sm:$0xff]  ;;  %v523_v2 = vld [vmem:[#allocation3 + $0xb8] sm:$0xff] }
 0x144   :  { %166 = vst.msk [vmem:[#allocation3 + $0x58] sm:$0xff] %vm117_vm2, %v1459_v62  ;;  %181 = vst.msk [vmem:[#allocation3 + $0x70] sm:$0xff] %vm117_vm2, %v1462_v63  ;;  %670 = vmatpush1.msra.mxu1 %v526_v0 }
 0x145   :  { %671 = vmatprep.subr.mxu1 %v1129_v1 }
 0x146   :  { %672 = vmatpush1.msra.mxu1 %v523_v2 }
 0x147   :  { %v1469_v3 = vpop.permute.xlu1 %126  ;;  %673 = vmatprep.subr.mxu1 %v1129_v1  ;;  %v1472_v4 = vpop.permute.xlu0 %141  ;;  %v520_v5 = vld [vmem:[#allocation3 + $0xa0] sm:$0xff]  ;;  %v517_v6 = vld [vmem:[#allocation3 + $0x88] sm:$0xff] }
 0x148   :  { %136 = vst.msk [vmem:[#allocation3 + $0x28] sm:$0xff] %vm117_vm2, %v1469_v3  ;;  %151 = vst.msk [vmem:[#allocation3 + $0x40] sm:$0xff] %vm117_vm2, %v1472_v4  ;;  %674 = vmatpush1.msra.mxu1 %v520_v5 }
 0x149   :  { %675 = vmatprep.subr.mxu1 %v1129_v1 }
 0x14a   :  { %676 = vmatpush1.msra.mxu1 %v517_v6 }
 0x14b   :  { %v1479_v7 = vpop.permute.xlu1 %466  ;;  %677 = vmatprep.subr.mxu1 %v1129_v1  ;;  %v1482_v8 = vpop.permute.xlu0 %484  ;;  %v514_v9 = vld [vmem:[#allocation3 + $0x70] sm:$0xff]  ;;  %v511_v10 = vld [vmem:[#allocation3 + $0x58] sm:$0xff] }
 0x14c   :  { %678 = vmatpush1.msra.mxu1 %v514_v9 }
 0x14d   :  { %679 = vmatprep.subr.mxu1 %v1129_v1 }
 0x14e   :  { %680 = vmatpush1.msra.mxu1 %v511_v10 }
 0x14f   :  { %v320_v11 = vpop.permute.xlu1 %319  ;;  %681 = vmatprep.subr.mxu1 %v1129_v1  ;;  %v335_v12 = vpop.permute.xlu0 %334  ;;  %v508_v13 = vld [vmem:[#allocation3 + $0x40] sm:$0xff]  ;;  %v505_v18 = vld [vmem:[#allocation3 + $0x28] sm:$0xff] }
 0x150   :  { %v324_v14 = vsel %vm323_vm4, %v1337_v22, %v320_v11  ;;  %v325_v15 = vsel %vm323_vm4, %v320_v11, %v1408_v43  ;;  %v339_v16 = vsel %vm338_vm5, %v1339_v23, %v335_v12  ;;  %v340_v17 = vsel %vm338_vm5, %v335_v12, %v1396_v40  ;;  %682 = vmatpush1.msra.mxu1 %v508_v13  ;;  %v502_v22 = vld [vmem:[#allocation3 + $0x10] sm:$0xff] }
 0x151   :  { %683 = vmatprep.subr.mxu1 %v1129_v1  ;;  %584 = vmatprep.subr.mxu0 %v340_v17  ;;  %vm488_vm4 = vcmask 424960   ;;  %vm128_vm5 = vcmask 1039360  }
 0x152   :  { %684 = vmatpush1.msra.mxu1 %v505_v18  ;;  %585 = vmatpush1.msra.mxu0 %v339_v16 }
 0x153   :  { %v290_v21 = vpop.permute.xlu1 %289  ;;  %685 = vmatprep.subr.mxu1 %v1129_v1  ;;  %v305_v24 = vpop.permute.xlu0 %304  ;;  %586 = vmatprep.subr.mxu0 %v325_v15 }
 0x154   :  { %v294_v35 = vsel %vm293_vm6, %v1345_v25, %v290_v21  ;;  %v295_v23 = vsel %vm293_vm6, %v290_v21, %v1417_v45  ;;  %v309_v40 = vsel %vm308_vm7, %v1347_v26, %v305_v24  ;;  %v310_v43 = vsel %vm308_vm7, %v305_v24, %v1406_v42  ;;  %686 = vmatpush1.msra.mxu1 %v502_v22 }
 0x155   :  { %587 = vmatpush1.msra.mxu0 %v324_v14  ;;  %701 = vmatprep.subr.mxu1 %v1129_v1  ;;  %vm470_vm6 = vcmask 433152   ;;  %vm452_vm7 = vcmask 441344  }
 0x156   :  { %588 = vmatprep.subr.mxu0 %v310_v43 }
 0x157   :  { %v260_v46 = vpop.permute.xlu1 %259  ;;  %v275_v49 = vpop.permute.xlu0 %274  ;;  %589 = vmatpush1.msra.mxu0 %v309_v40 }
 0x158   :  { %v264_v50 = vsel %vm263_vm8, %v1351_v27, %v260_v46  ;;  %v265_v25 = vsel %vm263_vm8, %v260_v46, %v1426_v48  ;;  %v279_v45 = vsel %vm278_vm9, %v1353_v28, %v275_v49  ;;  %v280_v26 = vsel %vm278_vm9, %v275_v49, %v1415_v44  ;;  %590 = vmatprep.subr.mxu0 %v295_v23 }
 0x159   :  { %591 = vmatpush1.msra.mxu0 %v294_v35  ;;  %vm434_vm8 = vcmask 449536   ;;  %vm416_vm9 = vcmask 457728  }
 0x15a   :  { %592 = vmatprep.subr.mxu0 %v280_v26 }
 0x15b   :  { %v230_v42 = vpop.permute.xlu1 %229  ;;  %v245_v51 = vpop.permute.xlu0 %244  ;;  %593 = vmatpush1.msra.mxu0 %v279_v45 }
 0x15c   :  { %v234_v52 = vsel %vm233_vm10, %v1357_v29, %v230_v42  ;;  %v235_v53 = vsel %vm233_vm10, %v230_v42, %v1442_v55  ;;  %v249_v27 = vsel %vm248_vm11, %v1359_v30, %v245_v51  ;;  %v250_v48 = vsel %vm248_vm11, %v245_v51, %v1424_v47  ;;  %594 = vmatprep.subr.mxu0 %v265_v25 }
 0x15d   :  { %595 = vmatpush1.msra.mxu0 %v264_v50  ;;  %vm398_vm10 = vcmask 572416   ;;  %vm383_vm11 = vcmask 580608  }
 0x15e   :  { %596 = vmatprep.subr.mxu0 %v250_v48 }
 0x15f   :  { %v200_v28 = vpop.permute.xlu1 %199  ;;  %v215_v44 = vpop.permute.xlu0 %214  ;;  %597 = vmatpush1.msra.mxu0 %v249_v27 }
 0x160   :  { %v204_v56 = vsel %vm203_vm12, %v1364_v31, %v200_v28  ;;  %v205_v57 = vsel %vm203_vm12, %v200_v28, %v1452_v59  ;;  %v219_v29 = vsel %vm218_vm13, %v1366_v32, %v215_v44  ;;  %v220_v55 = vsel %vm218_vm13, %v215_v44, %v1439_v54  ;;  %598 = vmatprep.subr.mxu0 %v235_v53 }
 0x161   :  { %599 = vmatpush1.msra.mxu0 %v234_v52  ;;  %vm353_vm12 = vcmask 596992   ;;  %vm736_vm13 = vcmask 64512  }
 0x162   :  { %600 = vmatprep.subr.mxu0 %v220_v55 }
 0x163   :  { %v170_v30 = vpop.permute.xlu1 %169  ;;  %v185_v47 = vpop.permute.xlu0 %184  ;;  %601 = vmatpush1.msra.mxu0 %v219_v29 }
 0x164   :  { %v174_v60 = vsel %vm173_vm14, %v1372_v33, %v170_v30  ;;  %v175_v61 = vsel %vm173_vm14, %v170_v30, %v1462_v63  ;;  %v189_v31 = vsel %vm188_vm15, %v1374_v34, %v185_v47  ;;  %v190_v59 = vsel %vm188_vm15, %v185_v47, %v1449_v58  ;;  %602 = vmatprep.subr.mxu0 %v205_v57 }
 0x165   :  { %603 = vmatpush1.msra.mxu0 %v204_v56 }
 0x166   :  { %604 = vmatprep.subr.mxu0 %v190_v59 }
 0x167   :  { %v140_v32 = vpop.permute.xlu1 %139  ;;  %v155_v54 = vpop.permute.xlu0 %154  ;;  %605 = vmatpush1.msra.mxu0 %v189_v31  ;;  %v498_v31 = vld [vmem:[%s1618_s1] sm:$0xff] }
 0x168   :  { %v144_v0 = vsel %vm143_vm0, %v1381_v36, %v140_v32  ;;  %v145_v2 = vsel %vm143_vm0, %v140_v32, %v1472_v4  ;;  %v159_v33 = vsel %vm158_vm1, %v1383_v37, %v155_v54  ;;  %v160_v63 = vsel %vm158_vm1, %v155_v54, %v1459_v62  ;;  %606 = vmatprep.subr.mxu0 %v175_v61 }
 0x169   :  { %607 = vmatpush1.msra.mxu0 %v174_v60 }
 0x16a   :  { %608 = vmatprep.subr.mxu0 %v160_v63 }
 0x16b   :  { %v483_v34 = vpop.permute.xlu1 %482  ;;  %v125_v58 = vpop.permute.xlu0 %124  ;;  %609 = vmatpush1.msra.mxu0 %v159_v33 }
 0x16c   :  { %v489_v5 = vsel %vm488_vm4, %v1389_v38, %v483_v34  ;;  %v490_v36 = vsel %vm488_vm4, %v483_v34, %v1482_v8  ;;  %v129_v4 = vsel %vm128_vm5, %v1391_v39, %v125_v58  ;;  %v130_v37 = vsel %vm128_vm5, %v125_v58, %v1469_v3  ;;  %610 = vmatprep.subr.mxu0 %v145_v2  ;;  %v1062_v58 = vld [vmem:[%s1619_s2 + $0x8] sm:$0xff] }
 0x16d   :  { %611 = vmatpush1.msra.mxu0 %v144_v0  ;;  %733 = vperm.xlu0 %1128, %v1062_v58  }
 0x16e   :  { %612 = vmatprep.subr.mxu0 %v130_v37 }
 0x16f   :  { %v447_v62 = vpop.permute.xlu1 %446  ;;  %v465_v6 = vpop.permute.xlu0 %464  ;;  %613 = vmatpush1.msra.mxu0 %v129_v4 }
 0x170   :  { %v471_v9 = vsel %vm470_vm6, %v1398_v41, %v465_v6  ;;  %v472_v38 = vsel %vm470_vm6, %v465_v6, %v1479_v7  ;;  %614 = vmatprep.subr.mxu0 %v1213_v19 }
 0x171   :  { %615 = vmatpush1.msra.mxu0 %v1215_v20 }
 0x172   :  { %630 = vmatprep.subr.mxu0 %v490_v36 }
 0x173   :  { %v445_v39 = vpop.permute.xlu1 %444  ;;  %v449_v3 = vpop.permute.xlu0 %448  ;;  %631 = vmatpush2.msra.mxu0 %v489_v5 }
 0x174   :  { %v453_v10 = vsel %vm452_vm7, %v445_v39, %v447_v62  ;;  %v454_v11 = vsel %vm452_vm7, %v447_v62, %v449_v3  ;;  %632 = vmatprep.subr.mxu0 %v472_v38  ;;  %v728_v38 = vld [vmem:[%s1620_s3] sm:$0xff] }
 0x175   :  { %633 = vmatpush2.msra.mxu0 %v471_v9 }
 0x176   :  { %634 = vmatprep.subr.mxu0 %v454_v11 }
 0x177   :  { %v431_v41 = vpop.permute.xlu1 %430  ;;  %v429_v12 = vpop.permute.xlu0 %428  ;;  %635 = vmatpush2.msra.mxu0 %v453_v10 }
 0x178   :  { %v436_v19 = vsel %vm434_vm8, %v429_v12, %v431_v41 }
 0x179   :  { %636 = vmatprep.subr.mxu0 %v436_v19 }
 0x17b   :  { %v411_v13 = vpop.permute.xlu1 %410  ;;  %v427_v20 = vpop.permute.xlu0 %426 }
 0x17c   :  { %v435_v14 = vsel %vm434_vm8, %v427_v20, %v429_v12 }
 0x17d   :  { %637 = vmatpush2.msra.mxu0 %v435_v14 }
 0x17f   :  { %v409_v15 = vpop.permute.xlu1 %408  ;;  %v1533_v16 = vpop.permute.xlu0 %412 }
 0x180   :  { %v417_v17 = vsel %vm416_vm9, %v409_v15, %v411_v13  ;;  %v418_v18 = vsel %vm416_vm9, %v411_v13, %v1533_v16 }
 0x181   :  { %638 = vmatprep.subr.mxu0 %v418_v18 }
 0x182   :  { %639 = vmatpush2.msra.mxu0 %v417_v17 }
 0x183   :  { %v395_v21 = vpop.permute.xlu1 %394  ;;  %v487_v24 = vpop.permute.xlu0 %486 }
 0x184   :  { %v491_v22 = vsel %vm488_vm4, %v1482_v8, %v487_v24 }
 0x185   :  { %497 = vst.msk [vmem:[#allocation3 + $0x250] sm:$0xff] %vm117_vm2, %v491_v22 }
 0x187   :  { %v393_v35 = vpop.permute.xlu1 %392  ;;  %v397_v23 = vpop.permute.xlu0 %396 }
 0x188   :  { %v399_v40 = vsel %vm398_vm10, %v393_v35, %v395_v21  ;;  %v400_v43 = vsel %vm398_vm10, %v395_v21, %v397_v23  ;;  %406 = vst.msk [vmem:[#allocation3 + $0x1d8] sm:$0xff] %vm117_vm2, %v397_v23  ;;  %v1040_v23 = vld [vmem:[%s1621_s4] sm:$0xff] }
 0x189   :  { %640 = vmatprep.subr.mxu0 %v400_v43 }
 0x18a   :  { %641 = vmatpush2.msra.mxu0 %v399_v40 }
 0x18b   :  { %v380_v46 = vpop.permute.xlu1 %379  ;;  %v469_v49 = vpop.permute.xlu0 %468 }
 0x18c   :  { %v473_v50 = vsel %vm470_vm6, %v1479_v7, %v469_v49  ;;  %v574_v25 = vld [vmem:[#allocation3 + $0x250] sm:$0xff]  ;;  %v1069_v49 = vld [vmem:[%s1621_s4 + $0x18] sm:$0xff] }
 0x18d   :  { %479 = vst.msk [vmem:[#allocation3 + $0x238] sm:$0xff] %vm117_vm2, %v473_v50  ;;  %702 = vmatpush2.msra.mxu1 %v574_v25  ;;  %v1041_v50 = vld [vmem:[%s1621_s4 + $0x8] sm:$0xff] }
 0x18e   :  { %703 = vmatprep.subr.mxu1 %v1129_v1 }
 0x18f   :  { %v378_v8 = vpop.permute.xlu1 %377  ;;  %v382_v45 = vpop.permute.xlu0 %381  ;;  %v559_v2 = vld [vmem:[#allocation3 + $0x1d8] sm:$0xff] }
 0x190   :  { %v384_v26 = vsel %vm383_vm11, %v378_v8, %v380_v46  ;;  %v385_v42 = vsel %vm383_vm11, %v380_v46, %v382_v45  ;;  %391 = vst.msk [vmem:[#allocation3 + $0x1c0] sm:$0xff] %vm117_vm2, %v382_v45  ;;  %v1070_v45 = vld [vmem:[%s1621_s4 + $0x20] sm:$0xff] }
 0x191   :  { %642 = vmatprep.subr.mxu0 %v385_v42 }
 0x192   :  { %643 = vmatpush2.msra.mxu0 %v384_v26 }
 0x193   :  { %v365_v51 = vpop.permute.xlu1 %364  ;;  %v451_v52 = vpop.permute.xlu0 %450 }
 0x194   :  { %v455_v53 = vsel %vm452_vm7, %v449_v3, %v451_v52  ;;  %v571_v7 = vld [vmem:[#allocation3 + $0x238] sm:$0xff] }
 0x195   :  { %461 = vst.msk [vmem:[#allocation3 + $0x220] sm:$0xff] %vm117_vm2, %v455_v53  ;;  %704 = vmatpush2.msra.mxu1 %v571_v7  ;;  %v1042_v7 = vld [vmem:[%s1621_s4 + $0x10] sm:$0xff] }
 0x196   :  { %705 = vmatprep.subr.mxu1 %v1129_v1 }
 0x197   :  { %v363_v27 = vpop.permute.xlu1 %362  ;;  %v367_v48 = vpop.permute.xlu0 %366  ;;  %v556_v33 = vld [vmem:[#allocation3 + $0x1c0] sm:$0xff] }
 0x198   :  { %v369_v28 = vsel %vm368_vm3, %v363_v27, %v365_v51  ;;  %v370_v44 = vsel %vm368_vm3, %v365_v51, %v367_v48  ;;  %376 = vst.msk [vmem:[#allocation3 + $0x1a8] sm:$0xff] %vm117_vm2, %v367_v48  ;;  %vm1169_vm3 = vmmov 0  }
 0x199   :  { %644 = vmatprep.subr.mxu0 %v370_v44 }
 0x19a   :  { %645 = vmatpush2.msra.mxu0 %v369_v28  ;;  %v1071_v28 = vld [vmem:[%s1621_s4 + $0x28] sm:$0xff] }
 0x19b   :  { %v350_v56 = vpop.permute.xlu1 %349  ;;  %v433_v57 = vpop.permute.xlu0 %432 }
 0x19c   :  { %v437_v29 = vsel %vm434_vm8, %v431_v41, %v433_v57  ;;  %v568_v55 = vld [vmem:[#allocation3 + $0x220] sm:$0xff] }
 0x19d   :  { %443 = vst.msk [vmem:[#allocation3 + $0x208] sm:$0xff] %vm117_vm2, %v437_v29  ;;  %706 = vmatpush2.msra.mxu1 %v568_v55 }
 0x19e   :  { %707 = vmatprep.subr.mxu1 %v1129_v1 }
 0x19f   :  { %v348_v30 = vpop.permute.xlu1 %347  ;;  %v352_v47 = vpop.permute.xlu0 %351  ;;  %v553_v63 = vld [vmem:[#allocation3 + $0x1a8] sm:$0xff] }
 0x1a0   :  { %v354_v60 = vsel %vm353_vm12, %v348_v30, %v350_v56  ;;  %v355_v61 = vsel %vm353_vm12, %v350_v56, %v352_v47  ;;  %361 = vst.msk [vmem:[#allocation3 + $0x190] sm:$0xff] %vm117_vm2, %v352_v47 }
 0x1a1   :  { %646 = vmatprep.subr.mxu0 %v355_v61 }
 0x1a2   :  { %647 = vmatpush2.msra.mxu0 %v354_v60 }
 0x1a3   :  { %v415_v59 = vpop.permute.xlu0 %414  ;;  %649 = vmatmul.mubr.f32.vlgmr.msra.gmra.mxu0 %v498_v31 }
 0x1a4   :  { %v419_v32 = vsel %vm416_vm9, %v1533_v16, %v415_v59  ;;  %v565_v54 = vld [vmem:[#allocation3 + $0x208] sm:$0xff]  ;;  %804 = vmatprep.mubr.f32.mxu0 %v1129_v1 }
 0x1a5   :  { %425 = vst.msk [vmem:[#allocation3 + $0x1f0] sm:$0xff] %vm117_vm2, %v419_v32  ;;  %708 = vmatpush2.msra.mxu1 %v565_v54  ;;  %v1065_v16 = vld [vmem:[%s1620_s3 + $0x8] sm:$0xff] }
 0x1a6   :  { %709 = vmatprep.subr.mxu1 %v1129_v1 }
 0x1a7   :  { %v550_v34 = vld [vmem:[#allocation3 + $0x190] sm:$0xff] }
 0x1ac   :  { %v562_v0 = vld [vmem:[#allocation3 + $0x1f0] sm:$0xff]  ;;  %v579_v5 = vpop.permute.xlu1 %578 }
 0x1ad   :  { %710 = vmatpush2.msra.mxu1 %v562_v0 }
 0x1ae   :  { %711 = vmatprep.subr.mxu1 %v1129_v1 }
 0x1af   :  { %712 = vmatpush2.msra.mxu1 %v559_v2 }
 0x1b0   :  { %713 = vmatprep.subr.mxu1 %v1129_v1 }
 0x1b1   :  { %714 = vmatpush2.msra.mxu1 %v556_v33 }
 0x1b2   :  { %715 = vmatprep.subr.mxu1 %v1129_v1 }
 0x1b3   :  { %716 = vmatpush2.msra.mxu1 %v553_v63 }
 0x1b4   :  { %717 = vmatprep.subr.mxu1 %v1129_v1 }
 0x1b5   :  { %718 = vmatpush2.msra.mxu1 %v550_v34 }
 0x1b6   :  { %720 = vmatmul.mubr.f32.vlgmr.msra.gmra.mxu1 %v498_v31  ;;  %1076 = vmatprep.subr.mxu1 %v1129_v1 }
 0x1b7   :  { %1078 = vmatprep.mubr.msk.f32.mxu1 %vm1169_vm3, %v1129_v1 }
 0x1e8   :  { %v734_v41 = vpop.permute.xlu0 %733 }
 0x263   :  { %v650_v36 = vpop.f32.mrf.mxu0 }
 0x264   :  { %v651_v4 = vadd.f32 %v650_v36, %v579_v5 }
 0x265   :  { %v652_v37 = vpop.f32.mrf.mxu0 }
 0x266   :  { %v653_v62 = vadd.f32 %v652_v37, %v579_v5  ;;  %v725_v6 = vmax.f32 %v651_v4, 0.0 }
 0x268   :  { %v726_v9 = vmax.f32 %v653_v62, 0.0 }
 0x26a   :  { %770 = vmatprep.subr.mxu0 %v726_v9 }
 0x26b   :  { %771 = vmatpush1.msra.mxu0 %v725_v6 }
 0x26c   :  { %1063 = vmatmul.mubr.msk.f32.vlgmr.msra.gmra.mxu0 %vm736_vm13, %v728_v38 }
 0x26d   :  { %960 = vmatprep.mubr.f32.mxu0 %v1129_v1 }
 0x276   :  { %v721_v39 = vpop.f32.mrf.mxu1 }
 0x277   :  { %v722_v3 = vadd.f32 %v721_v39, %v579_v5 }
 0x278   :  { %v723_v10 = vpop.f32.mrf.mxu1 }
 0x279   :  { %v727_v11 = vmax.f32 %v722_v3, 0.0 }
 0x27b   :  { %1077 = vmatpush3.msra.mxu1 %v727_v11 }
 0x27c   :  { %1079 = vmatmul.mubr.msk.f32.vlgmr.msra.gmra.mxu1 %vm736_vm13, %v728_v38  ;;  %1081 = vmatprep.subr.mxu1 %v1129_v1 }
 0x27d   :  { %1083 = vmatprep.mubr.msk.f32.mxu1 %vm1169_vm3, %v1129_v1  ;;  %v891_v1 = vpop.permute.xlu1 %890 }
 0x32c   :  { %v806_v12 = vpop.f32.mrf.mxu0 }
 0x32d   :  { %v807_v19 = vadd.f32 %v806_v12, %v734_v41 }
 0x32e   :  { %v808_v13 = vpop.f32.mrf.mxu0 }
 0x32f   :  { %v809_v20 = vadd.f32 %v808_v13, %v734_v41  ;;  %v881_v14 = vmax.f32 %v807_v19, 0.0 }
 0x331   :  { %v882_v15 = vmax.f32 %v809_v20, 0.0 }
 0x333   :  { %926 = vmatprep.subr.mxu0 %v882_v15 }
 0x334   :  { %927 = vmatpush1.msra.mxu0 %v881_v14 }
 0x335   :  { %1067 = vmatmul.mubr.msk.f32.vlgmr.msra.gmra.mxu0 %vm736_vm13, %v1065_v16 }
 0x33c   :  { %v877_v17 = vpop.f32.mrf.mxu1 }
 0x33d   :  { %v878_v18 = vadd.f32 %v877_v17, %v734_v41 }
 0x33e   :  { %v1080_v21 = vpop.f32.mrf.mxu1 }
 0x33f   :  { %v883_v24 = vmax.f32 %v878_v18, 0.0 }
 0x341   :  { %1082 = vmatpush3.msra.mxu1 %v883_v24 }
 0x342   :  { %1084 = vmatmul.mubr.msk.f32.vlgmr.msra.gmra.mxu1 %vm736_vm13, %v1065_v16 }
 0x3f5   :  { %v962_v22 = vpop.f32.mrf.mxu0 }
 0x3f6   :  { %v963_v35 = vadd.f32 %v962_v22, %v891_v1 }
 0x3f7   :  { %v964_v40 = vpop.f32.mrf.mxu0 }
 0x3f8   :  { %v1037_v43 = vmax.f32 %v963_v35, 0.0  ;;  %v965_v46 = vadd.f32 %v964_v40, %v891_v1 }
 0x3fa   :  { %v1043_v25 = vmul.f32 %v1040_v23, %v1037_v43  ;;  %v1038_v8 = vmax.f32 %v965_v46, 0.0 }
 0x3fc   :  { %v1050_v26 = vadd.f32 %v1069_v49, %v1043_v25  ;;  %v1044_v42 = vmul.f32 %v1041_v50, %v1038_v8 }
 0x3fe   :  { %1053 = vst [vmem:[%s1622_s5] sm:$0xff] %v1050_v26  ;;  %v1051_v51 = vadd.f32 %v1070_v45, %v1044_v42 }
 0x400   :  { %1054 = vst [vmem:[%s1622_s5 + $0x8] sm:$0xff] %v1051_v51 }
 0x402   :  { %v1033_v52 = vpop.f32.mrf.mxu1 }
 0x403   :  { %v1034_v53 = vadd.f32 %v1033_v52, %v891_v1 }
 0x404   :  { %v1085_v27 = vpop.f32.mrf.mxu1 }
 0x405   :  { %v1039_v48 = vmax.f32 %v1034_v53, 0.0 }
 0x407   :  { %v1045_v44 = vmul.f32 %v1042_v7, %v1039_v48 }
 0x409   :  { %v1052_v56 = vadd.f32 %v1071_v28, %v1045_v44 }
 0x40b   :  { %1055 = vst.msk [vmem:[%s1622_s5 + $0x10] sm:$0xff] %vm117_vm2, %v1052_v56 }

</bundles_post_ra>
